<compile_context>
chip_gen: v7x
topology: tpu7x:2x2x1
jax: 0.10.0
libtpu: 0.0.40
codegen_flags: <defaults>
</compile_context>

<pallas_src>
import jax
import jax.numpy as jnp
from jax.experimental import pallas as pl
from jax.experimental.pallas import tpu as pltpu


def _make_mlp_kernel(n_hidden):
    """Fused MLP kernel for `n_hidden` (H, H) hidden blocks.

    Ref order (n_hidden > 0):  x, w_in, b_in, w_hid, b_hid, w_out, b_out, out
    Ref order (n_hidden == 0): x, w_in, b_in, w_out, b_out, out
    Activations are (features, tile_n): points live on the lane axis.
    """

    def kernel(*refs):
        x_ref = refs[0]
        o_ref = refs[-1]
        w_in_ref, b_in_ref = refs[1], refs[2]
        if n_hidden > 0:
            w_hid_ref, b_hid_ref = refs[3], refs[4]
        w_out_ref, b_out_ref = refs[-3], refs[-2]

        h = x_ref[...].astype(jnp.float32)                      # (2, tile_n)
        h = jnp.tanh(
            jnp.dot(w_in_ref[...], h, preferred_element_type=jnp.float32)
            + b_in_ref[...]
        )                                                       # (H, tile_n)
        for l in range(n_hidden):                               # static unroll
            h = jnp.tanh(
                jnp.dot(w_hid_ref[l], h, preferred_element_type=jnp.float32)
                + b_hid_ref[l]
            )
        o_ref[...] = (
            jnp.dot(w_out_ref[...], h, preferred_element_type=jnp.float32)
            + b_out_ref[...]
        ).astype(o_ref.dtype)                                   # (3, tile_n)

    return kernel


def _const_spec(shape):
    """Full-array block, same block for every grid step (replicated params)."""
    zeros = (0,) * len(shape)
    return pl.BlockSpec(shape, lambda i: zeros)


def mlp_forward(x, weights, biases, *, tile_n=None):
    """Fused MLP forward pass.

    x:       (N, 2) float32 (PyTorch convention, feature axis last).
    weights: list of (out_dim, in_dim) float32 (PyTorch nn.Linear layout).
    biases:  list of (out_dim,) float32.
    returns: (N, 3) float32.
    """
    n_layers = len(weights)
    assert n_layers >= 2, "need at least input and output Linear layers"
    n_hidden = n_layers - 2
    N, in_dim = x.shape
    H = weights[0].shape[0]
    out_dim = weights[-1].shape[0]

    # Lane-dense tile (multiple of 128).  Use as few grid steps as possible,
    # but keep >= 2 steps when N allows so v7x can use both TensorCores.
    if tile_n is None:
        n128 = pl.cdiv(N, 128)
        tile_n = max(128, min(2048, pl.cdiv(n128, 2) * 128))
    assert tile_n % 128 == 0

    n_pad = pl.cdiv(N, tile_n) * tile_n
    grid = (n_pad // tile_n,)

    # Host-side prep: points onto lanes; pack hidden-layer params.
    xt = x.T                                                    # (2, N)
    if n_pad != N:
        xt = jnp.pad(xt, ((0, 0), (0, n_pad - N)))

    w_in = weights[0]                                           # (H, 2)
    b_in = biases[0].reshape(H, 1)                              # (H, 1)
    w_out = weights[-1]                                         # (3, H)
    b_out = biases[-1].reshape(out_dim, 1)                      # (3, 1)

    inputs = [xt, w_in, b_in]
    in_specs = [
        pl.BlockSpec((in_dim, tile_n), lambda i: (0, i)),
        _const_spec(w_in.shape),
        _const_spec(b_in.shape),
    ]
    if n_hidden > 0:
        w_hid = jnp.stack(weights[1:-1])                        # (L, H, H)
        b_hid = jnp.stack([b.reshape(H, 1) for b in biases[1:-1]])  # (L, H, 1)
        inputs += [w_hid, b_hid]
        in_specs += [_const_spec(w_hid.shape), _const_spec(b_hid.shape)]
    inputs += [w_out, b_out]
    in_specs += [_const_spec(w_out.shape), _const_spec(b_out.shape)]

    out_spec = pl.BlockSpec((out_dim, tile_n), lambda i: (0, i))

    grid_spec = pltpu.PrefetchScalarGridSpec(
        num_scalar_prefetch=0,
        grid=grid,
        in_specs=in_specs,
        out_specs=out_spec,
    )

    out_t = pl.pallas_call(
        _make_mlp_kernel(n_hidden),
        out_shape=jax.ShapeDtypeStruct((out_dim, n_pad), jnp.float32),
        grid_spec=grid_spec,
        compiler_params=pltpu.CompilerParams(
            dimension_semantics=("parallel",)
        ),
    )(*inputs)

    return out_t[:, :N].T                                       # (N, 3)


def init_params(key, hidden_layers, nodes_per_layer):
    """Deterministic init mimicking PyTorch nn.Linear default U[-1/sqrt(fan_in), +].

    Returns weights in PyTorch layout (out_dim, in_dim) and biases as (out_dim,).
    """
    dims = [2] + [nodes_per_layer] * (hidden_layers + 1) + [3]
    weights, biases = [], []
    for i in range(len(dims) - 1):
        fan_in, fan_out = dims[i], dims[i + 1]
        key, kw, kb = jax.random.split(key, 3)
        bound = 1.0 / jnp.sqrt(jnp.float32(fan_in))
        w = jax.random.uniform(kw, (fan_out, fan_in), jnp.float32, -bound, bound)
        b = jax.random.uniform(kb, (fan_out,), jnp.float32, -bound, bound)
        weights.append(w)
        biases.append(b)
    return weights, biases


def reference_forward(x, weights, biases):
    h = x
    for i, (w, b) in enumerate(zip(weights, biases)):
        h = h @ w.T + b
        if i < len(weights) - 1:
            h = jnp.tanh(h)
    return h


if __name__ == "__main__":
    hidden_layers = 2       # number of Linear(H, H) hidden blocks
    nodes_per_layer = 32    # H
    N = 1024                # number of (x, y) collocation points

    key = jax.random.PRNGKey(0)
    key, kx = jax.random.split(key)
    x = jax.random.normal(kx, (N, 2), dtype=jnp.float32)

    weights, biases = init_params(key, hidden_layers, nodes_per_layer)

    out = mlp_forward(x, weights, biases)       # auto tile_n = 512 -> 2 steps
    out = jax.block_until_ready(out)

    ref = reference_forward(x, weights, biases)
    assert out.shape == (N, 3)
    assert jnp.allclose(out, ref, atol=1e-5, rtol=1e-5), "mismatch vs. reference"

    print("KERNEL_OK")
</pallas_src>

<mosaic_0001>
module attributes {stable_mosaic.version = 11 : i64} {
  func.func @kernel(%arg0: i32, %arg1: memref<2x512xf32, #tpu.memory_space<vmem>>, %arg2: memref<32x2xf32, #tpu.memory_space<vmem>>, %arg3: memref<32x1xf32, #tpu.memory_space<vmem>>, %arg4: memref<2x32x32xf32, #tpu.memory_space<vmem>>, %arg5: memref<2x32x1xf32, #tpu.memory_space<vmem>>, %arg6: memref<3x32xf32, #tpu.memory_space<vmem>>, %arg7: memref<3x1xf32, #tpu.memory_space<vmem>>, %arg8: memref<3x512xf32, #tpu.memory_space<vmem>>) attributes {dimension_semantics = [#tpu.dimension_semantics<parallel>], iteration_bounds = array<i64: 2>, scalar_prefetch = 0 : i64, scratch_operands = 0 : i64, tpu.core_type = #tpu.core_type<tc>, window_params = [{transform_indices = @transform_0, window_bounds = array<i64: 2, 512>}, {pipeline_mode = #tpu.pipeline_mode<synchronous>, transform_indices = @transform_1, window_bounds = array<i64: 32, 2>}, {pipeline_mode = #tpu.pipeline_mode<synchronous>, transform_indices = @transform_2, window_bounds = array<i64: 32, 1>}, {pipeline_mode = #tpu.pipeline_mode<synchronous>, transform_indices = @transform_3, window_bounds = array<i64: 2, 32, 32>}, {pipeline_mode = #tpu.pipeline_mode<synchronous>, transform_indices = @transform_4, window_bounds = array<i64: 2, 32, 1>}, {pipeline_mode = #tpu.pipeline_mode<synchronous>, transform_indices = @transform_5, window_bounds = array<i64: 3, 32>}, {pipeline_mode = #tpu.pipeline_mode<synchronous>, transform_indices = @transform_6, window_bounds = array<i64: 3, 1>}, {transform_indices = @transform_7, window_bounds = array<i64: 3, 512>}]} {
    %c0 = arith.constant 0 : index
    %c0_0 = arith.constant 0 : index
    %0 = vector.load %arg1[%c0, %c0_0] : memref<2x512xf32, #tpu.memory_space<vmem>>, vector<2x512xf32>
    %c0_1 = arith.constant 0 : index
    %c0_2 = arith.constant 0 : index
    %1 = vector.load %arg2[%c0_1, %c0_2] : memref<32x2xf32, #tpu.memory_space<vmem>>, vector<32x2xf32>
    %cst = arith.constant dense<0.000000e+00> : vector<32x512xf32>
    %2 = tpu.matmul %1, %0, %cst {dimension_numbers = #tpu.dot_dimension_numbers<[1], [0], [0], [1], [0, 0, 1, 1], [], []>} : vector<32x2xf32>, vector<2x512xf32>, vector<32x512xf32> -> vector<32x512xf32>
    %c0_3 = arith.constant 0 : index
    %c0_4 = arith.constant 0 : index
    %3 = vector.load %arg3[%c0_3, %c0_4] : memref<32x1xf32, #tpu.memory_space<vmem>>, vector<32x1xf32>
    %4 = vector.broadcast %3 : vector<32x1xf32> to vector<32x512xf32>
    %5 = arith.addf %2, %4 : vector<32x512xf32>
    %6 = math.tanh %5 : vector<32x512xf32>
    %c0_5 = arith.constant 0 : index
    %c0_6 = arith.constant 0 : index
    %c0_7 = arith.constant 0 : index
    %7 = vector.load %arg4[%c0_5, %c0_6, %c0_7] : memref<2x32x32xf32, #tpu.memory_space<vmem>>, vector<1x32x32xf32>
    %8 = vector.shape_cast %7 : vector<1x32x32xf32> to vector<32x32xf32>
    %cst_8 = arith.constant dense<0.000000e+00> : vector<32x512xf32>
    %9 = tpu.matmul %8, %6, %cst_8 {dimension_numbers = #tpu.dot_dimension_numbers<[1], [0], [0], [1], [0, 0, 1, 1], [], []>} : vector<32x32xf32>, vector<32x512xf32>, vector<32x512xf32> -> vector<32x512xf32>
    %c0_9 = arith.constant 0 : index
    %c0_10 = arith.constant 0 : index
    %c0_11 = arith.constant 0 : index
    %10 = vector.load %arg5[%c0_9, %c0_10, %c0_11] : memref<2x32x1xf32, #tpu.memory_space<vmem>>, vector<1x32x1xf32>
    %11 = vector.shape_cast %10 : vector<1x32x1xf32> to vector<32x1xf32>
    %12 = vector.broadcast %11 : vector<32x1xf32> to vector<32x512xf32>
    %13 = arith.addf %9, %12 : vector<32x512xf32>
    %14 = math.tanh %13 : vector<32x512xf32>
    %c1 = arith.constant 1 : index
    %c0_12 = arith.constant 0 : index
    %c0_13 = arith.constant 0 : index
    %15 = vector.load %arg4[%c1, %c0_12, %c0_13] : memref<2x32x32xf32, #tpu.memory_space<vmem>>, vector<1x32x32xf32>
    %16 = vector.shape_cast %15 : vector<1x32x32xf32> to vector<32x32xf32>
    %cst_14 = arith.constant dense<0.000000e+00> : vector<32x512xf32>
    %17 = tpu.matmul %16, %14, %cst_14 {dimension_numbers = #tpu.dot_dimension_numbers<[1], [0], [0], [1], [0, 0, 1, 1], [], []>} : vector<32x32xf32>, vector<32x512xf32>, vector<32x512xf32> -> vector<32x512xf32>
    %c1_15 = arith.constant 1 : index
    %c0_16 = arith.constant 0 : index
    %c0_17 = arith.constant 0 : index
    %18 = vector.load %arg5[%c1_15, %c0_16, %c0_17] : memref<2x32x1xf32, #tpu.memory_space<vmem>>, vector<1x32x1xf32>
    %19 = vector.shape_cast %18 : vector<1x32x1xf32> to vector<32x1xf32>
    %20 = vector.broadcast %19 : vector<32x1xf32> to vector<32x512xf32>
    %21 = arith.addf %17, %20 : vector<32x512xf32>
    %22 = math.tanh %21 : vector<32x512xf32>
    %c0_18 = arith.constant 0 : index
    %c0_19 = arith.constant 0 : index
    %23 = vector.load %arg6[%c0_18, %c0_19] : memref<3x32xf32, #tpu.memory_space<vmem>>, vector<3x32xf32>
    %cst_20 = arith.constant dense<0.000000e+00> : vector<3x512xf32>
    %24 = tpu.matmul %23, %22, %cst_20 {dimension_numbers = #tpu.dot_dimension_numbers<[1], [0], [0], [1], [0, 0, 1, 1], [], []>} : vector<3x32xf32>, vector<32x512xf32>, vector<3x512xf32> -> vector<3x512xf32>
    %c0_21 = arith.constant 0 : index
    %c0_22 = arith.constant 0 : index
    %25 = vector.load %arg7[%c0_21, %c0_22] : memref<3x1xf32, #tpu.memory_space<vmem>>, vector<3x1xf32>
    %26 = vector.broadcast %25 : vector<3x1xf32> to vector<3x512xf32>
    %27 = arith.addf %24, %26 : vector<3x512xf32>
    %c0_23 = arith.constant 0 : index
    %c0_24 = arith.constant 0 : index
    %28 = vector.load %arg8[%c0_23, %c0_24] : memref<3x512xf32, #tpu.memory_space<vmem>>, vector<3x512xf32>
    tpu.vector_store %arg8[%c0_23, %c0_24], %27 {strides = array<i32>} : memref<3x512xf32, #tpu.memory_space<vmem>>, vector<3x512xf32>,
    return
  }
  func.func @transform_0(%arg0: i32) -> (i32, i32) {
    %c0_i32 = arith.constant 0 : i32
    %c0_i32_0 = arith.constant 0 : i32
    return %c0_i32, %arg0 : i32, i32
  }
  func.func @transform_1(%arg0: i32) -> (i32, i32) {
    %c0_i32 = arith.constant 0 : i32
    %c0_i32_0 = arith.constant 0 : i32
    %c0_i32_1 = arith.constant 0 : i32
    return %c0_i32, %c0_i32_0 : i32, i32
  }
  func.func @transform_2(%arg0: i32) -> (i32, i32) {
    %c0_i32 = arith.constant 0 : i32
    %c0_i32_0 = arith.constant 0 : i32
    %c0_i32_1 = arith.constant 0 : i32
    return %c0_i32, %c0_i32_0 : i32, i32
  }
  func.func @transform_3(%arg0: i32) -> (i32, i32, i32) {
    %c0_i32 = arith.constant 0 : i32
    %c0_i32_0 = arith.constant 0 : i32
    %c0_i32_1 = arith.constant 0 : i32
    %c0_i32_2 = arith.constant 0 : i32
    return %c0_i32, %c0_i32_0, %c0_i32_1 : i32, i32, i32
  }
  func.func @transform_4(%arg0: i32) -> (i32, i32, i32) {
    %c0_i32 = arith.constant 0 : i32
    %c0_i32_0 = arith.constant 0 : i32
    %c0_i32_1 = arith.constant 0 : i32
    %c0_i32_2 = arith.constant 0 : i32
    return %c0_i32, %c0_i32_0, %c0_i32_1 : i32, i32, i32
  }
  func.func @transform_5(%arg0: i32) -> (i32, i32) {
    %c0_i32 = arith.constant 0 : i32
    %c0_i32_0 = arith.constant 0 : i32
    %c0_i32_1 = arith.constant 0 : i32
    return %c0_i32, %c0_i32_0 : i32, i32
  }
  func.func @transform_6(%arg0: i32) -> (i32, i32) {
    %c0_i32 = arith.constant 0 : i32
    %c0_i32_0 = arith.constant 0 : i32
    %c0_i32_1 = arith.constant 0 : i32
    return %c0_i32, %c0_i32_0 : i32, i32
  }
  func.func @transform_7(%arg0: i32) -> (i32, i32) {
    %c0_i32 = arith.constant 0 : i32
    %c0_i32_0 = arith.constant 0 : i32
    return %c0_i32, %arg0 : i32, i32
  }
}

</mosaic_0001>

<bundles_post_ra>
// kernel: tpu_custom_call.1
= control target key start
LH: loop header
LB: loop body
LE: loop exit
PB: predicated region body
PF: predicated region fallthrough
CT: control target
= control target key end

     0   :  { %12 = vsyncpa [#allocation3], 0  ;;  %s1827_s0 = inlined_call_operand.vmem [shape: f32[2,1024], index: 0, kind: input, shape index: {}]   ;;  %s1828_s1 = inlined_call_operand.vmem [shape: f32[32,2], index: 1, kind: input, shape index: {}]   ;;  %s1829_s2 = inlined_call_operand.vmem [shape: f32[32,1], index: 2, kind: input, shape index: {}]   ;;  %s1830_s3 = inlined_call_operand.vmem [shape: f32[2,32,32], index: 3, kind: input, shape index: {}]   ;;  %s1831_s4 = inlined_call_operand.vmem [shape: f32[2,32,1], index: 4, kind: input, shape index: {}]   ;;  %s1832_s5 = inlined_call_operand.vmem [shape: f32[3,32], index: 5, kind: input, shape index: {}]   ;;  %s1833_s6 = inlined_call_operand.vmem [shape: f32[3,1], index: 6, kind: input, shape index: {}]   ;;  %s1834_s7 = inlined_call_operand.hbm [shape: f32[3,1024], index: 7, kind: output, shape index: {}]  }
   0x1   :  { %14 = vsyncpa [#allocation3 + $0x1], 0  ;;  %s1598_s24 = smov 0   ;;  %s1600_s25 = smov 0  }
   0x2   :  { %s1602_s26 = smov 0   ;;  %s1604_s27 = smov 0  }
   0x3 LB: > { %s1619_s28 = sadd.s32 4294967295, %s1552_s27   ;;  %s1250_s29 = sadd.s32 4294967294, %s1552_s27   ;;  %s1552_s27 = sphi %s1604_s27, %s1840_s27   ;;  %s1548_s26 = sphi %s1602_s26, %s1839_s26   ;;  %s1544_s25 = sphi %s1600_s25, %s1838_s25   ;;  %s1540_s24 = sphi %s1598_s24, %s1837_s24  }
   0x4   : > { %s1623_s30 = sadd.s32 1, %s1552_s27   ;;  %s179_s8 = sadd.s32 1, %s1548_s26 }
   0x5   : > { %s176_s9 = ssub.s32 %s1552_s27, %s1623_s30  ;;  %p189_p0 = scmp.ne.s32.totalorder %s1548_s26, %s1544_s25 }
   0x6   : > { %p177_p1 = scmp.eq.s32.totalorder %s176_s9, 0  ;;  %p190_p2 = scmp.eq.s32.totalorder %s1619_s28, 1 }
   0x7   : > { %p195_p3 = scmp.ne.s32.totalorder %s1544_s25, %s1540_s24  ;;  %p196_p4 = scmp.eq.s32.totalorder %s1250_s29, 1 }
   0x8   : > { %s1634_s10 = scalar_select %p177_p1, %s1548_s26, %s179_s8  }
   0x9   : > { %p1636_p5 = por %p190_p2, %p189_p0  ;;  %p1640_p6 = por %p196_p4, %p195_p3 }
   0xa   : > { %p1253_p7 = scmp.ge.s32.totalorder %s1552_s27, 1  ;;  %p241_p8 = scmp.lt.s32.totalorder %s1552_s27, 3 }
   0xc   : > { %p242_p9 = pnand %p1253_p7, %p241_p8 }
   0xd   : > { %s1255_s13 = sshll.u32 (!%p242_p9), %s1619_s28, 2  ;;  %v314_v0 = vlaneseq (!%p242_p9)  ;;  %v1554_v1 = vmov (!%p242_p9), 1983009808   ;;  %v1555_v3 = vmov (!%p242_p9), 0.0   ;;  %v1556_v5 = vmov (!%p242_p9), 0   ;;  %v285_v6 = vld [vmem:[%s1829_s2] sm:$0xff] (!%p242_p9) }
   0xe   : > { %245 = sbr.rel (%p242_p9) target bundleno = 996 (0x3e4), region = 48  ;;  %p274_p10 = scmp.lt.s32.totalorder (!%p242_p9), %s1255_s13, 7  ;;  %v312_v2 = vunpack.c.l.s4 (!%p242_p9), %v1554_v1  ;;  %413 = vmatprep.mubr.f32.mxu0 (!%p242_p9), %v1555_v3  ;;  %502 = vmatprep.mubr.f32.mxu1 (!%p242_p9), %v1555_v3  ;;  %v287_v8 = vld [vmem:[%s1829_s2 + $0x10] sm:$0xff] (!%p242_p9)  ;;  %v286_v9 = vld [vmem:[%s1829_s2 + $0x8] sm:$0xff] (!%p242_p9)  ;;  %v288_v11 = vld [vmem:[%s1829_s2 + $0x18] sm:$0xff] (!%p242_p9)  ;;  %vm340_vm0 = vcmask (!%p242_p9), 1041408  }
   0xf   : > { %v315_v4 = vshrl.u32 (!%p242_p9), %v314_v0, 7  ;;  %1391 = vset.pattern.permute.xlu0 (!%p242_p9), %v1556_v5  ;;  %1392 = vset.pattern.permute.xlu1 (!%p242_p9), %v1556_v5  ;;  %v547_v15 = vld [vmem:[%s1831_s4] sm:$0xff] (!%p242_p9)  ;;  %v548_v16 = vld [vmem:[%s1831_s4 + $0x8] sm:$0xff] (!%p242_p9)  ;;  %vm327_vm1 = vcmask (!%p242_p9), 15360   ;;  %v549_v21 = vld [vmem:[%s1831_s4 + $0x10] sm:$0xff] (!%p242_p9)  ;;  %vm571_vm2 = vcmask (!%p242_p9), 261120  }
  0x10   : > { %v313_v7 = vunpack.c.0.s8 (!%p242_p9), %v312_v2  ;;  %291 = vperm.xlu0 (!%p242_p9), %1391, %v285_v6   ;;  %301 = vperm.xlu1 (!%p242_p9), %1392, %v287_v8   ;;  %v281_v19 = vld [vmem:[%s1828_s1] sm:$0xff] (!%p242_p9)  ;;  %v550_v22 = vld [vmem:[%s1831_s4 + $0x18] sm:$0xff] (!%p242_p9)  ;;  %v282_v23 = vld [vmem:[%s1828_s1 + $0x8] sm:$0xff] (!%p242_p9)  ;;  %s1300_s16 = sshll.u32 (!%p242_p9), %s1619_s28, 8  ;;  %s1557_s28 = smov (!%p242_p9), [#allocation2]  }
  0x11   : > { %v1281_v24 = vld [vmem:[%s1831_s4 + $0x20] sm:$0xff] (!%p242_p9)  ;;  %v1282_v25 = vld [vmem:[%s1831_s4 + $0x28] sm:$0xff] (!%p242_p9)  ;;  %v283_v26 = vld [vmem:[%s1828_s1 + $0x10] sm:$0xff] (!%p242_p9)  ;;  %s1785_s21 = scalar_lea.hbm (!%p242_p9), %s1834_s7, %s1300_s16  ;;  %s1494_s29 = sshll.u32 (!%p242_p9), %s1557_s28, 4  ;;  %s1495_s29 = int_to_ptr.vmem [resolvable:$false] %s1494_s29 }
  0x12   : > { %v316_v10 = vsub.s32 (!%p242_p9), %v313_v7, %v315_v4  ;;  %v1283_v27 = vld [vmem:[%s1831_s4 + $0x30] sm:$0xff] (!%p242_p9)  ;;  %v1284_v28 = vld [vmem:[%s1831_s4 + $0x38] sm:$0xff] (!%p242_p9)  ;;  %v1015_v30 = vld [vmem:[%s1833_s6] sm:$0x7] (!%p242_p9) }
  0x13   : > { %v284_v29 = vld [vmem:[%s1828_s1 + $0x18] sm:$0xff] (!%p242_p9) }
  0x14   : > { %296 = vperm.xlu0 (!%p242_p9), %1391, %v286_v9   ;;  %306 = vperm.xlu1 (!%p242_p9), %1392, %v288_v11  }
  0x15   : > { %s1842_s13 = smov (!%p274_p10, %s1255_s13), 7 }
  0x16   : > { %s1256_s20 = sshll.u32 %s1842_s13, 1  ;;  %s270_s13 = sand.u32 1, %s1544_s25  }
  0x17   : > { %s277_s8 = scalar_lea.vmem %s1827_s0, %s1256_s20  ;;  %s1254_s15 = sshll.u32 %s270_s13, 4 }
  0x18   : > { %v280_v12 = vld [vmem:[%s277_s8] sm:$0xff]  ;;  %553 = vperm.xlu0 %1391, %v547_v15   ;;  %558 = vperm.xlu1 %1392, %v548_v16   ;;  %s272_s17 = scalar_lea.vmem [#allocation2], %s1254_s15  ;;  %s1177_s22 = scalar_lea.sflag [#allocation3], %s270_s13 }
  0x19   : > { %v317_v13 = vrot.slane %v280_v12, %v316_v10  ;;  %v310_v14 = vcombine.high %v280_v12, %v280_v12  ;;  %s1191_s18 = sshll.u32 %s272_s17, 4  ;;  %s1496_s8 = scalar_lea.vmem %s1495_s29, 512  ;;  %s1787_s18 = int_to_ptr.vmem [resolvable:$true] %s1191_s18 }
  0x1a   : > { %s1490_s23 = scalar_lea.vmem %s1787_s18, 256  ;;  %p1497_p0 = scmp.lt.s32.totalorder %s1787_s18, %s1495_s29 }
  0x1b   : > { %v325_v17 = vcombine.high %v317_v13, %v317_v13  ;;  %v324_v18 = vrot.slane %v310_v14, %v316_v10  ;;  %p1491_p11 = scmp.ne.s32.totalorder %s1787_s18, %s1490_s23  ;;  %p1498_p1 = scmp.lt.s32.totalorder %s1496_s8, %s1490_s23 }
  0x1c   : > { %563 = vperm.xlu0 %1391, %v549_v21   ;;  %568 = vperm.xlu1 %1392, %v550_v22  }
  0x1d   : > { %1257 = vmatprep.subr.msk.mxu0 %vm340_vm0, %v325_v17  ;;  %v326_v20 = vcombine.high %v324_v18, %v324_v18  ;;  %p1492_p12 = pnand %p1491_p11, %p1636_p5  ;;  %p1499_p2 = por %p1498_p1, %p1497_p0 }
  0x1e   : > { %1258 = vmatpush1.msk.msra.mxu0 %vm340_vm0, %v317_v13 }
  0x1f   : > { %1259 = vmatmul.mubr.msk.f32.vlgmr.msra.gmra.mrb[0].mxu0 %vm327_vm1, %v281_v19  ;;  %1263 = vmatprep.subr.msk.mxu1 %vm340_vm0, %v326_v20  ;;  %p1493_p13 = pneg %p1492_p12 }
  0x20   : > { %1264 = vmatpush1.msk.msra.mxu1 %vm340_vm0, %v324_v18  ;;  %419 = vmatprep.mubr.f32.mxu0 %v1555_v3 }
  0x21   : > { %1265 = vmatmul.mubr.msk.f32.vlgmr.msra.gmra.mrb[0].mxu1 %vm327_vm1, %v281_v19  ;;  %790 = vperm.xlu0 %1391, %v1281_v24   ;;  %p1500_p3 = pnand %p1499_p2, %p1493_p13 }
  0x22   : > { %508 = vmatprep.mubr.f32.mxu1 %v1555_v3  ;;  %795 = vperm.xlu1 %1392, %v1282_v25  }
  0x23   : > { %1260 = vmatmul.mubr.msk.f32.gmra.mrb[2].mxu0 %vm327_vm1, %v282_v23 }
  0x24   : > { %425 = vmatprep.mubr.f32.mxu0 %v1555_v3 }
  0x25   : > { %1266 = vmatmul.mubr.msk.f32.gmra.mrb[2].mxu1 %vm327_vm1, %v282_v23  ;;  %800 = vperm.xlu0 %1391, %v1283_v27  }
  0x26   : > { %514 = vmatprep.mubr.f32.mxu1 %v1555_v3  ;;  %805 = vperm.xlu1 %1392, %v1284_v28   ;;  %v543_v28 = vld [vmem:[%s1830_s3] sm:$0xff] }
  0x27   : > { %1261 = vmatmul.mubr.msk.f32.gmra.mrb[4].mxu0 %vm327_vm1, %v283_v26 }
  0x28   : > { %431 = vmatprep.mubr.f32.mxu0 %v1555_v3 }
  0x29   : > { %1267 = vmatmul.mubr.msk.f32.gmra.mrb[4].mxu1 %vm327_vm1, %v283_v26  ;;  %1018 = vperm.xlu0 %1391, %v1015_v30   ;;  %v545_v30 = vld [vmem:[%s1830_s3 + $0x10] sm:$0xff] }
  0x2a   : > { %520 = vmatprep.mubr.f32.mxu1 %v1555_v3 }
  0x2b   : > { %1262 = vmatmul.mubr.msk.f32.gmra.mrb[6].mxu0 %vm327_vm1, %v284_v29 }
  0x2c   : > { %648 = vmatprep.mubr.f32.mxu0 %v1555_v3 }
  0x2d   : > { %1268 = vmatmul.mubr.msk.f32.gmra.mrb[6].mxu1 %vm327_vm1, %v284_v29  ;;  %v544_v29 = vld [vmem:[%s1830_s3 + $0x8] sm:$0xff] }
  0x2e   : > { %737 = vmatprep.mubr.f32.mxu1 %v1555_v3 }
  0x8f   : > { %v292_v31 = vpop.permute.xlu0 %291  ;;  %v302_v44 = vpop.permute.xlu1 %301 }
  0x93   : > { %v297_v39 = vpop.permute.xlu0 %296  ;;  %v307_v57 = vpop.permute.xlu1 %306 }
  0xf2   : > { %v415_v32 = vpop.f32.mrb[0].mxu0 }
  0xf3   : > { %v416_v33 = vadd.f32 %v415_v32, %v292_v31  ;;  %v417_v34 = vpop.f32.mrb[1].mxu0  ;;  %v554_v32 = vpop.permute.xlu0 %553 }
  0xf4   : > { %v418_v35 = vadd.f32 %v417_v34, %v292_v31  ;;  %v504_v36 = vpop.f32.mrb[0].mxu1 }
  0xf5   : > { %1394 = vtanh.f32 %v416_v33  ;;  %v505_v37 = vadd.f32 %v504_v36, %v292_v31  ;;  %v506_v38 = vpop.f32.mrb[1].mxu1 }
  0xf6   : > { %1396 = vtanh.f32 %v418_v35  ;;  %v507_v40 = vadd.f32 %v506_v38, %v292_v31  ;;  %v421_v41 = vpop.f32.mrb[2].mxu0  ;;  %v546_v31 = vld [vmem:[%s1830_s3 + $0x18] sm:$0xff] }
  0xf7   : > { %1398 = vtanh.f32 %v505_v37  ;;  %v422_v42 = vadd.f32 %v421_v41, %v297_v39  ;;  %v423_v43 = vpop.f32.mrb[3].mxu0 }
  0xf8   : > { %1400 = vtanh.f32 %v507_v40  ;;  %v424_v45 = vadd.f32 %v423_v43, %v297_v39  ;;  %v510_v46 = vpop.f32.mrb[2].mxu1  ;;  %v559_v40 = vpop.permute.xlu1 %558 }
  0xf9   : > { %1402 = vtanh.f32 %v422_v42  ;;  %v511_v47 = vadd.f32 %v510_v46, %v297_v39  ;;  %v512_v48 = vpop.f32.mrb[3].mxu1 }
  0xfa   : > { %1404 = vtanh.f32 %v424_v45  ;;  %v513_v49 = vadd.f32 %v512_v48, %v297_v39  ;;  %v427_v50 = vpop.f32.mrb[4].mxu0 }
  0xfb   : > { %1406 = vtanh.f32 %v511_v47  ;;  %v428_v51 = vadd.f32 %v427_v50, %v302_v44  ;;  %v429_v52 = vpop.f32.mrb[5].mxu0 }
  0xfc   : > { %1408 = vtanh.f32 %v513_v49  ;;  %v430_v53 = vadd.f32 %v429_v52, %v302_v44  ;;  %v516_v54 = vpop.f32.mrb[4].mxu1  ;;  %v564_v49 = vpop.permute.xlu0 %563 }
  0xfd   : > { %1410 = vtanh.f32 %v428_v51  ;;  %v517_v55 = vadd.f32 %v516_v54, %v302_v44  ;;  %v518_v56 = vpop.f32.mrb[5].mxu1 }
  0xfe   : > { %1412 = vtanh.f32 %v430_v53  ;;  %v519_v58 = vadd.f32 %v518_v56, %v302_v44  ;;  %v433_v59 = vpop.f32.mrb[6].mxu0 }
  0xff   : > { %v1395_v60 = vpop.eup %1394  ;;  %1414 = vtanh.f32 %v517_v55  ;;  %v434_v61 = vadd.f32 %v433_v59, %v307_v57  ;;  %v435_v62 = vpop.f32.mrb[7].mxu0 }
 0x100   : > { %v1397_v63 = vpop.eup %1396  ;;  %1416 = vtanh.f32 %v519_v58  ;;  %v436_v0 = vadd.f32 %v435_v62, %v307_v57  ;;  %v522_v1 = vpop.f32.mrb[6].mxu1 }
 0x101   : > { %v1399_v2 = vpop.eup %1398  ;;  %1418 = vtanh.f32 %v434_v61  ;;  %v523_v4 = vadd.f32 %v522_v1, %v307_v57  ;;  %v524_v5 = vpop.f32.mrb[7].mxu1 }
 0x102   : > { %v1401_v6 = vpop.eup %1400  ;;  %1420 = vtanh.f32 %v436_v0  ;;  %v525_v7 = vadd.f32 %v524_v5, %v307_v57  ;;  %v569_v58 = vpop.permute.xlu1 %568 }
 0x103   : > { %v1403_v8 = vpop.eup %1402  ;;  %1422 = vtanh.f32 %v523_v4 }
 0x104   : > { %v1405_v9 = vpop.eup %1404  ;;  %1424 = vtanh.f32 %v525_v7  ;;  %v1303_v10 = vpack.c.bf16 %v1403_v8, %v1395_v60 }
 0x105   : > { %v1407_v11 = vpop.eup %1406  ;;  %v1301_v12 = vpack.c.bf16 %v1405_v9, %v1397_v63 }
 0x106   : > { %v1409_v13 = vpop.eup %1408  ;;  %v1311_v14 = vpack.c.bf16 %v1407_v11, %v1399_v2 }
 0x107   : > { %v1411_v15 = vpop.eup %1410  ;;  %1302 = vmatprep.subr.bf16.mxu0 %v1301_v12  ;;  %v1309_v16 = vpack.c.bf16 %v1409_v13, %v1401_v6 }
 0x108   : > { %v1413_v17 = vpop.eup %1412  ;;  %1304 = vmatpush1.bf16.msra.mxu0 %v1303_v10 }
 0x109   : > { %v1415_v18 = vpop.eup %1414  ;;  %1310 = vmatprep.subr.bf16.mxu1 %v1309_v16 }
 0x10a   : > { %v1417_v19 = vpop.eup %1416  ;;  %1312 = vmatpush1.bf16.msra.mxu1 %v1311_v14 }
 0x10b   : > { %v1419_v20 = vpop.eup %1418 }
 0x10c   : > { %v1421_v21 = vpop.eup %1420  ;;  %v1307_v22 = vpack.c.bf16 %v1419_v20, %v1411_v15 }
 0x10d   : > { %v1423_v23 = vpop.eup %1422  ;;  %v1305_v24 = vpack.c.bf16 %v1421_v21, %v1413_v17 }
 0x10e   : > { %v1425_v25 = vpop.eup %1424  ;;  %v1315_v26 = vpack.c.bf16 %v1423_v23, %v1415_v18 }
 0x10f   : > { %1306 = vmatprep.subr.bf16.mxu0 %v1305_v24  ;;  %v1313_v27 = vpack.c.bf16 %v1425_v25, %v1417_v19 }
 0x110   : > { %1308 = vmatpush1.bf16.msra.mxu0 %v1307_v22 }
 0x111   : > { %1314 = vmatprep.subr.bf16.mxu1 %v1313_v27 }
 0x112   : > { %1316 = vmatpush1.bf16.msra.mxu1 %v1315_v26 }
 0x113   : > { %1269 = vmatmul.mubr.msk.f32.vlgmr.msra.gmra.mrb[8].mxu0 %vm571_vm2, %v543_v28 }
 0x114   : > { %654 = vmatprep.mubr.f32.mxu0 %v1555_v3 }
 0x115   : > { %1273 = vmatmul.mubr.msk.f32.vlgmr.msra.gmra.mrb[8].mxu1 %vm571_vm2, %v543_v28 }
 0x116   : > { %743 = vmatprep.mubr.f32.mxu1 %v1555_v3 }
 0x117   : > { %1270 = vmatmul.mubr.msk.f32.gmra.mrb[10].mxu0 %vm571_vm2, %v544_v29 }
 0x118   : > { %660 = vmatprep.mubr.f32.mxu0 %v1555_v3 }
 0x119   : > { %1274 = vmatmul.mubr.msk.f32.gmra.mrb[10].mxu1 %vm571_vm2, %v544_v29  ;;  %v1277_v29 = vld [vmem:[%s1830_s3 + $0x20] sm:$0xff] }
 0x11a   : > { %749 = vmatprep.mubr.f32.mxu1 %v1555_v3 }
 0x11b   : > { %1271 = vmatmul.mubr.msk.f32.gmra.mrb[12].mxu0 %vm571_vm2, %v545_v30 }
 0x11c   : > { %666 = vmatprep.mubr.f32.mxu0 %v1555_v3 }
 0x11d   : > { %1275 = vmatmul.mubr.msk.f32.gmra.mrb[12].mxu1 %vm571_vm2, %v545_v30  ;;  %v1278_v30 = vld [vmem:[%s1830_s3 + $0x28] sm:$0xff] }
 0x11e   : > { %755 = vmatprep.mubr.f32.mxu1 %v1555_v3 }
 0x11f   : > { %1272 = vmatmul.mubr.msk.f32.gmra.mrb[14].mxu0 %vm571_vm2, %v546_v31 }
 0x120   : > { %884 = vmatprep.mubr.f32.mxu0 %v1555_v3 }
 0x121   : > { %1276 = vmatmul.mubr.msk.f32.gmra.mrb[14].mxu1 %vm571_vm2, %v546_v31  ;;  %v1279_v31 = vld [vmem:[%s1830_s3 + $0x30] sm:$0xff] }
 0x122   : > { %973 = vmatprep.mubr.f32.mxu1 %v1555_v3 }
 0x1e6   : > { %v650_v33 = vpop.f32.mrb[8].mxu0 }
 0x1e7   : > { %v651_v34 = vadd.f32 %v650_v33, %v554_v32  ;;  %v652_v35 = vpop.f32.mrb[9].mxu0  ;;  %v791_v33 = vpop.permute.xlu0 %790 }
 0x1e8   : > { %v653_v36 = vadd.f32 %v652_v35, %v554_v32  ;;  %v739_v37 = vpop.f32.mrb[8].mxu1 }
 0x1e9   : > { %1426 = vtanh.f32 %v651_v34  ;;  %v740_v38 = vadd.f32 %v739_v37, %v554_v32  ;;  %v741_v39 = vpop.f32.mrb[9].mxu1 }
 0x1ea   : > { %1428 = vtanh.f32 %v653_v36  ;;  %v742_v41 = vadd.f32 %v741_v39, %v554_v32  ;;  %v656_v42 = vpop.f32.mrb[10].mxu0  ;;  %v1280_v32 = vld [vmem:[%s1830_s3 + $0x38] sm:$0xff] }
 0x1eb   : > { %1430 = vtanh.f32 %v740_v38  ;;  %v657_v43 = vadd.f32 %v656_v42, %v559_v40  ;;  %v658_v44 = vpop.f32.mrb[11].mxu0 }
 0x1ec   : > { %1432 = vtanh.f32 %v742_v41  ;;  %v659_v45 = vadd.f32 %v658_v44, %v559_v40  ;;  %v745_v46 = vpop.f32.mrb[10].mxu1  ;;  %v796_v41 = vpop.permute.xlu1 %795 }
 0x1ed   : > { %1434 = vtanh.f32 %v657_v43  ;;  %v746_v47 = vadd.f32 %v745_v46, %v559_v40  ;;  %v747_v48 = vpop.f32.mrb[11].mxu1 }
 0x1ee   : > { %1436 = vtanh.f32 %v659_v45  ;;  %v748_v50 = vadd.f32 %v747_v48, %v559_v40  ;;  %v662_v51 = vpop.f32.mrb[12].mxu0 }
 0x1ef   : > { %1438 = vtanh.f32 %v746_v47  ;;  %v663_v52 = vadd.f32 %v662_v51, %v564_v49  ;;  %v664_v53 = vpop.f32.mrb[13].mxu0 }
 0x1f0   : > { %1440 = vtanh.f32 %v748_v50  ;;  %v665_v54 = vadd.f32 %v664_v53, %v564_v49  ;;  %v751_v55 = vpop.f32.mrb[12].mxu1 }
 0x1f1   : > { %1442 = vtanh.f32 %v663_v52  ;;  %v752_v56 = vadd.f32 %v751_v55, %v564_v49  ;;  %v753_v57 = vpop.f32.mrb[13].mxu1 }
 0x1f2   : > { %1444 = vtanh.f32 %v665_v54  ;;  %v754_v59 = vadd.f32 %v753_v57, %v564_v49  ;;  %v668_v60 = vpop.f32.mrb[14].mxu0  ;;  %v801_v49 = vpop.permute.xlu0 %800 }
 0x1f3   : > { %v1427_v61 = vpop.eup %1426  ;;  %1446 = vtanh.f32 %v752_v56  ;;  %v669_v62 = vadd.f32 %v668_v60, %v569_v58  ;;  %v670_v63 = vpop.f32.mrb[15].mxu0 }
 0x1f4   : > { %v1429_v0 = vpop.eup %1428  ;;  %1448 = vtanh.f32 %v754_v59  ;;  %v671_v1 = vadd.f32 %v670_v63, %v569_v58  ;;  %v757_v2 = vpop.f32.mrb[14].mxu1 }
 0x1f5   : > { %v1431_v4 = vpop.eup %1430  ;;  %1450 = vtanh.f32 %v669_v62  ;;  %v758_v5 = vadd.f32 %v757_v2, %v569_v58  ;;  %v759_v6 = vpop.f32.mrb[15].mxu1 }
 0x1f6   : > { %v1433_v7 = vpop.eup %1432  ;;  %1452 = vtanh.f32 %v671_v1  ;;  %v760_v8 = vadd.f32 %v759_v6, %v569_v58  ;;  %v806_v58 = vpop.permute.xlu1 %805 }
 0x1f7   : > { %v1435_v9 = vpop.eup %1434  ;;  %1454 = vtanh.f32 %v758_v5 }
 0x1f8   : > { %v1437_v10 = vpop.eup %1436  ;;  %1456 = vtanh.f32 %v760_v8  ;;  %v1319_v11 = vpack.c.bf16 %v1435_v9, %v1427_v61 }
 0x1f9   : > { %v1439_v12 = vpop.eup %1438  ;;  %v1317_v13 = vpack.c.bf16 %v1437_v10, %v1429_v0 }
 0x1fa   : > { %v1441_v14 = vpop.eup %1440  ;;  %v1327_v15 = vpack.c.bf16 %v1439_v12, %v1431_v4 }
 0x1fb   : > { %v1443_v16 = vpop.eup %1442  ;;  %1318 = vmatprep.subr.bf16.mxu0 %v1317_v13  ;;  %v1325_v17 = vpack.c.bf16 %v1441_v14, %v1433_v7 }
 0x1fc   : > { %v1445_v18 = vpop.eup %1444  ;;  %1320 = vmatpush1.bf16.msra.mxu0 %v1319_v11 }
 0x1fd   : > { %v1447_v19 = vpop.eup %1446  ;;  %1326 = vmatprep.subr.bf16.mxu1 %v1325_v17 }
 0x1fe   : > { %v1449_v20 = vpop.eup %1448  ;;  %1328 = vmatpush1.bf16.msra.mxu1 %v1327_v15 }
 0x1ff   : > { %v1451_v21 = vpop.eup %1450 }
 0x200   : > { %v1453_v22 = vpop.eup %1452  ;;  %v1323_v23 = vpack.c.bf16 %v1451_v21, %v1443_v16 }
 0x201   : > { %v1455_v24 = vpop.eup %1454  ;;  %v1321_v25 = vpack.c.bf16 %v1453_v22, %v1445_v18 }
 0x202   : > { %v1457_v26 = vpop.eup %1456  ;;  %v1331_v27 = vpack.c.bf16 %v1455_v24, %v1447_v19 }
 0x203   : > { %1322 = vmatprep.subr.bf16.mxu0 %v1321_v25  ;;  %v1329_v28 = vpack.c.bf16 %v1457_v26, %v1449_v20 }
 0x204   : > { %1324 = vmatpush1.bf16.msra.mxu0 %v1323_v23 }
 0x205   : > { %1330 = vmatprep.subr.bf16.mxu1 %v1329_v28 }
 0x206   : > { %1332 = vmatpush1.bf16.msra.mxu1 %v1331_v27 }
 0x207   : > { %1285 = vmatmul.mubr.msk.f32.vlgmr.msra.gmra.mrb[16].mxu0 %vm571_vm2, %v1277_v29 }
 0x208   : > { %890 = vmatprep.mubr.f32.mxu0 %v1555_v3 }
 0x209   : > { %1289 = vmatmul.mubr.msk.f32.vlgmr.msra.gmra.mrb[16].mxu1 %vm571_vm2, %v1277_v29  ;;  %v1014_v29 = vld [vmem:[%s1832_s5] sm:$0x7] }
 0x20a   : > { %979 = vmatprep.mubr.f32.mxu1 %v1555_v3 }
 0x20b   : > { %1286 = vmatmul.mubr.msk.f32.gmra.mrb[18].mxu0 %vm571_vm2, %v1278_v30 }
 0x20c   : > { %896 = vmatprep.mubr.f32.mxu0 %v1555_v3 }
 0x20d   : > { %1290 = vmatmul.mubr.msk.f32.gmra.mrb[18].mxu1 %vm571_vm2, %v1278_v30  ;;  %v1019_v30 = vpop.permute.xlu0 %1018 }
 0x20e   : > { %985 = vmatprep.mubr.f32.mxu1 %v1555_v3 }
 0x20f   : > { %1287 = vmatmul.mubr.msk.f32.gmra.mrb[20].mxu0 %vm571_vm2, %v1279_v31 }
 0x210   : > { %902 = vmatprep.mubr.f32.mxu0 %v1555_v3 }
 0x211   : > { %1291 = vmatmul.mubr.msk.f32.gmra.mrb[20].mxu1 %vm571_vm2, %v1279_v31 }
 0x212   : > { %991 = vmatprep.mubr.f32.mxu1 %v1555_v3 }
 0x213   : > { %1288 = vmatmul.mubr.msk.f32.gmra.mrb[22].mxu0 %vm571_vm2, %v1280_v32 }
 0x214   : > { %1088 = vmatprep.mubr.f32.mxu0 %v1555_v3 }
 0x215   : > { %1292 = vmatmul.mubr.msk.f32.gmra.mrb[22].mxu1 %vm571_vm2, %v1280_v32 }
 0x216   : > { %1159 = vmatprep.mubr.f32.mxu1 %v1555_v3 }
 0x2da   : > { %v886_v34 = vpop.f32.mrb[16].mxu0 }
 0x2db   : > { %v887_v35 = vadd.f32 %v886_v34, %v791_v33  ;;  %v888_v36 = vpop.f32.mrb[17].mxu0 }
 0x2dc   : > { %v889_v37 = vadd.f32 %v888_v36, %v791_v33  ;;  %v975_v38 = vpop.f32.mrb[16].mxu1 }
 0x2dd   : > { %1458 = vtanh.f32 %v887_v35  ;;  %v976_v39 = vadd.f32 %v975_v38, %v791_v33  ;;  %v977_v40 = vpop.f32.mrb[17].mxu1 }
 0x2de   : > { %1460 = vtanh.f32 %v889_v37  ;;  %v978_v42 = vadd.f32 %v977_v40, %v791_v33  ;;  %v892_v43 = vpop.f32.mrb[18].mxu0 }
 0x2df   : > { %1462 = vtanh.f32 %v976_v39  ;;  %v893_v44 = vadd.f32 %v892_v43, %v796_v41  ;;  %v894_v45 = vpop.f32.mrb[19].mxu0 }
 0x2e0   : > { %1464 = vtanh.f32 %v978_v42  ;;  %v895_v46 = vadd.f32 %v894_v45, %v796_v41  ;;  %v981_v47 = vpop.f32.mrb[18].mxu1 }
 0x2e1   : > { %1466 = vtanh.f32 %v893_v44  ;;  %v982_v3 = vadd.f32 %v981_v47, %v796_v41  ;;  %v983_v48 = vpop.f32.mrb[19].mxu1 }
 0x2e2   : > { %1468 = vtanh.f32 %v895_v46  ;;  %v984_v50 = vadd.f32 %v983_v48, %v796_v41  ;;  %v898_v51 = vpop.f32.mrb[20].mxu0 }
 0x2e3   : > { %1470 = vtanh.f32 %v982_v3  ;;  %v899_v52 = vadd.f32 %v898_v51, %v801_v49  ;;  %v900_v53 = vpop.f32.mrb[21].mxu0 }
 0x2e4   : > { %1472 = vtanh.f32 %v984_v50  ;;  %v901_v54 = vadd.f32 %v900_v53, %v801_v49  ;;  %v987_v55 = vpop.f32.mrb[20].mxu1 }
 0x2e5   : > { %1474 = vtanh.f32 %v899_v52  ;;  %v988_v56 = vadd.f32 %v987_v55, %v801_v49  ;;  %v989_v57 = vpop.f32.mrb[21].mxu1 }
 0x2e6   : > { %1476 = vtanh.f32 %v901_v54  ;;  %v990_v59 = vadd.f32 %v989_v57, %v801_v49  ;;  %v904_v60 = vpop.f32.mrb[22].mxu0 }
 0x2e7   : > { %v1459_v61 = vpop.eup %1458  ;;  %1478 = vtanh.f32 %v988_v56  ;;  %v905_v62 = vadd.f32 %v904_v60, %v806_v58  ;;  %v906_v63 = vpop.f32.mrb[23].mxu0 }
 0x2e8   : > { %v1461_v0 = vpop.eup %1460  ;;  %1480 = vtanh.f32 %v990_v59  ;;  %v907_v1 = vadd.f32 %v906_v63, %v806_v58  ;;  %v993_v2 = vpop.f32.mrb[22].mxu1 }
 0x2e9   : > { %v1463_v4 = vpop.eup %1462  ;;  %1482 = vtanh.f32 %v905_v62  ;;  %v994_v5 = vadd.f32 %v993_v2, %v806_v58  ;;  %v995_v6 = vpop.f32.mrb[23].mxu1 }
 0x2ea   : > { %v1465_v7 = vpop.eup %1464  ;;  %1484 = vtanh.f32 %v907_v1  ;;  %v996_v8 = vadd.f32 %v995_v6, %v806_v58 }
 0x2eb   : > { %v1467_v9 = vpop.eup %1466  ;;  %1486 = vtanh.f32 %v994_v5 }
 0x2ec   : > { %v1469_v10 = vpop.eup %1468  ;;  %1488 = vtanh.f32 %v996_v8  ;;  %v1335_v11 = vpack.c.bf16 %v1467_v9, %v1459_v61 }
 0x2ed   : > { %v1471_v12 = vpop.eup %1470  ;;  %v1333_v13 = vpack.c.bf16 %v1469_v10, %v1461_v0 }
 0x2ee   : > { %v1473_v14 = vpop.eup %1472  ;;  %v1343_v15 = vpack.c.bf16 %v1471_v12, %v1463_v4 }
 0x2ef   : > { %v1475_v16 = vpop.eup %1474  ;;  %1334 = vmatprep.subr.bf16.mxu0 %v1333_v13  ;;  %v1341_v17 = vpack.c.bf16 %v1473_v14, %v1465_v7 }
 0x2f0   : > { %v1477_v18 = vpop.eup %1476  ;;  %1336 = vmatpush1.bf16.msra.mxu0 %v1335_v11 }
 0x2f1   : > { %v1479_v19 = vpop.eup %1478  ;;  %1342 = vmatprep.subr.bf16.mxu1 %v1341_v17 }
 0x2f2   : > { %v1481_v20 = vpop.eup %1480  ;;  %1344 = vmatpush1.bf16.msra.mxu1 %v1343_v15 }
 0x2f3   : > { %v1483_v21 = vpop.eup %1482 }
 0x2f4   : > { %v1485_v22 = vpop.eup %1484  ;;  %v1339_v23 = vpack.c.bf16 %v1483_v21, %v1475_v16 }
 0x2f5   : > { %v1487_v24 = vpop.eup %1486  ;;  %v1337_v25 = vpack.c.bf16 %v1485_v22, %v1477_v18 }
 0x2f6   : > { %v1489_v26 = vpop.eup %1488  ;;  %v1347_v27 = vpack.c.bf16 %v1487_v24, %v1479_v19 }
 0x2f7   : > { %1338 = vmatprep.subr.bf16.mxu0 %v1337_v25  ;;  %v1345_v28 = vpack.c.bf16 %v1489_v26, %v1481_v20 }
 0x2f8   : > { %1340 = vmatpush1.bf16.msra.mxu0 %v1339_v23 }
 0x2f9   : > { %1346 = vmatprep.subr.bf16.mxu1 %v1345_v28 }
 0x2fa   : > { %1348 = vmatpush1.bf16.msra.mxu1 %v1347_v27 }
 0x2fb   : > { %1293 = vmatmul.mubr.msk.f32.vlgmr.msra.gmra.mrb[24].mxu0 %vm571_vm2, %v1014_v29 }
 0x2fd   : > { %1294 = vmatmul.mubr.msk.f32.vlgmr.msra.gmra.mrb[24].mxu1 %vm571_vm2, %v1014_v29 }
 0x3ce   : > { %v1090_v31 = vpop.f32.mrb[24].mxu0 }
 0x3cf   : > { %v1091_v32 = vadd.f32 %v1090_v31, %v1019_v30  ;;  %v1092_v33 = vpop.f32.mrb[25].mxu0 }
 0x3d0   : > { %v1093_v34 = vadd.f32 %v1092_v33, %v1019_v30  ;;  %v1161_v35 = vpop.f32.mrb[24].mxu1 }
 0x3d1   : > { %v1162_v36 = vadd.f32 %v1161_v35, %v1019_v30  ;;  %v1163_v37 = vpop.f32.mrb[25].mxu1 }
 0x3d2   : > { %v1170_v38 = vcombine.low %v1091_v32, %v1093_v34  ;;  %v1164_v39 = vadd.f32 %v1163_v37, %v1019_v30 }
 0x3d4   : > { %1174 = vst [vmem:[%s272_s17] sm:$0x77] %v1170_v38  ;;  %v1171_v40 = vcombine.low %v1162_v36, %v1164_v39 }
 0x3d6   : > { %1175 = vst [vmem:[%s272_s17 + $0x8] sm:$0x77] %v1171_v40 }
 0x3d7   : > { %1503 = shalt.err (!%p1500_p3)
}
 0x3d8   : > { %s1504_s9 = scalar_lea.hbm %s1785_s21, 256  ;;  %s1508_s15 = scalar_lea.hbm %s1834_s7, 512 }
 0x3d9   : > { %p1505_p4 = scmp.ne.s32.totalorder %s1785_s21, %s1504_s9  ;;  %p1509_p9 = scmp.lt.u32.totalorder %s1785_s21, %s1834_s7 }
 0x3da   : > { %p1510_p10 = scmp.lt.u32.totalorder %s1508_s15, %s1504_s9  ;;  %p1512_p12 = scmp.lt.u32.totalorder %s1504_s9, %s1785_s21 }
 0x3db   : > { %p1506_p7 = pnand %p1505_p4, %p1636_p5 }
 0x3dc   : > { %p1511_p11 = por %p1510_p10, %p1509_p9 }
 0x3dd   : > { %p1507_p8 = pneg %p1506_p7 }
 0x3de   : > { %p1513_p13 = por %p1512_p12, %p1511_p11 }
 0x3e0   : > { %p1514_p0 = pnand %p1513_p13, %p1507_p8 }
 0x3e2   : > { %1517 = shalt.err (!%p1514_p0)
}
 0x3e3   : > { %1349 = dma.vmem_to_hbm [thread:$0]  (%p1636_p5), %s1787_s18, 256, %s1785_s21, %s1177_s22  }
 0x3e4 PF: > { %p1355_p1 = scmp.ge.s32.totalorder %s1552_s27, 2  ;;  %s1203_s19 = sand.u32 1, %s1540_s24  }
 0x3e5   : > { %s1204_s20 = scalar_lea.sflag [#allocation3], %s1203_s19 }
 0x3e6   : > { %p1352_p2 = pnand %p1355_p1, %p1640_p6 }
 0x3e8   : > { %1535 = dma.done.wait (!%p1352_p2), %s1204_s20, 256  }
 0x3e9   : > { %1537 = vsyncadd (!%p1352_p2), %s1204_s20, 4294967040  ;;  %p17_p3 = scmp.ge.s32.totalorder %s1623_s30, 4   ;;  %s1837_s24 = smov %s1544_s25 }
 0x3ea   : > { %s1838_s25 = smov %s1548_s26  ;;  %s1839_s26 = smov %s1634_s10 }
 0x3eb   : > { %s1840_s27 = smov %s1623_s30  ;;  %19 = sbr.rel (!%p17_p3) target bundleno = 3 (0x3), region = 85 }
 0x3f2   :  { %1209 = vsyncpa [#allocation3], 1 }
 0x3f3   :  { %1211 = vsyncpa [#allocation3 + $0x1], 1 }

</bundles_post_ra>
